<compile_context>
chip_gen: v5e
topology: v5e:2x2
jax: 0.10.0
libtpu: 0.0.40
codegen_flags: <defaults>
</compile_context>

<pallas_src>
import functools

import jax
import jax.numpy as jnp
from jax.experimental import pallas as pl
from jax.experimental.pallas import tpu as pltpu

GAMMA = 0.7


def _gamma_kernel(x_ref, o_ref, *, gamma):
    # x**gamma == exp(gamma * log(x)).  The explicit form avoids XLA pow's
    # sign/zero special-case compares/selects (lower VPU/vreg pressure) and
    # keeps the heavy work on the EUP (log, exp) plus one VPU mul.
    # Compute in f32 (v5e has no bf16 VPU/EUP path; keeps gamma exact for
    # bf16 inputs), cast only on store.
    x = x_ref[...].astype(jnp.float32)
    y = jnp.exp(jnp.float32(gamma) * jnp.log(x))
    o_ref[...] = y.astype(o_ref.dtype)


def _choose_width(aligned_total: int) -> int:
    """Widest lane-dense last dim (multiple of 128) dividing aligned_total."""
    for w in (2048, 1024, 512, 256, 128):
        if aligned_total % w == 0:
            return w
    return 128  # unreachable: aligned_total is already a multiple of 128


def _pick_block_rows(rows: int, width: int, itemsize: int,
                     target_block_bytes: int, sublane: int) -> int:
    """Sublane-aligned rows-per-block; keeps >= 2 grid steps for big slabs."""
    total_bytes = rows * width * itemsize
    by_bytes = max(1, target_block_bytes // (width * itemsize))
    block_rows = min(rows, by_bytes)
    # v7x has 2 TensorCores: a single-step grid idles one of them and kills
    # DMA/compute overlap.  Force >= 2 steps whenever the slab is > ~2 MiB.
    if block_rows >= rows and total_bytes > (2 << 20):
        block_rows = pl.cdiv(rows, 2)
    if block_rows < rows:
        # Align to the dtype's sublane packing so non-final blocks stay
        # unmasked full tiles (the ragged last block, if any, is masked by
        # Pallas partial-block handling).
        block_rows = max(sublane, (block_rows // sublane) * sublane)
    return min(block_rows, rows)


def gamma_module(x: jax.Array, gamma: float = GAMMA,
                 *, target_block_bytes: int = 4 << 20) -> jax.Array:
    """Applies x ** gamma elementwise.  x may be any shape (e.g. NCHW)."""
    orig_shape = x.shape
    dtype = x.dtype
    total = x.size
    if total == 0:
        return x
    itemsize = jnp.dtype(dtype).itemsize

    flat = x.reshape(-1)
    main = (total // 128) * 128  # 128-aligned prefix (== total in NCHW case)

    if main == 0:
        # Tiny input (< 128 elements): plain jnp, no kernel launch.
        y = jnp.exp(jnp.float32(gamma) * jnp.log(flat.astype(jnp.float32)))
        return y.astype(dtype).reshape(orig_shape)

    if main == total:
        x_main, tail = flat, None
    else:
        # Rare unaligned path: kernel on the aligned prefix, plain jnp on the
        # <128-element tail.  No full-array pad/slice round trip.
        x_main, tail = flat[:main], flat[main:]

    width = _choose_width(main)
    rows = main // width
    sublane = max(8, 32 // itemsize)  # 8 f32 / 16 bf16 / 32 int8-fp8
    block_rows = _pick_block_rows(rows, width, itemsize,
                                  target_block_bytes, sublane)
    grid = (pl.cdiv(rows, block_rows),)

    out2d = pl.pallas_call(
        functools.partial(_gamma_kernel, gamma=gamma),
        out_shape=jax.ShapeDtypeStruct((rows, width), dtype),
        grid=grid,
        in_specs=[pl.BlockSpec((block_rows, width), lambda i: (i, 0))],
        out_specs=pl.BlockSpec((block_rows, width), lambda i: (i, 0)),
        compiler_params=pltpu.CompilerParams(
            dimension_semantics=("parallel",),
            # 4 MiB blocks, double-buffered in+out = 16 MiB peak; raise the
            # scoped VMEM limit so v5e's 16 MiB default doesn't OOM.  32 MiB
            # is within physical VMEM on v5e/v6e (128 MiB) and v7x (64 MiB).
            vmem_limit_bytes=32 << 20,
        ),
        cost_estimate=pl.CostEstimate(
            flops=main,                   # one mul per element (gamma * log x)
            transcendentals=2 * main,     # exp + log per element
            bytes_accessed=2 * main * itemsize,
        ),
    )(x_main.reshape(rows, width))

    out_main = out2d.reshape(main)
    if tail is None:
        return out_main.reshape(orig_shape)
    tail_out = jnp.exp(jnp.float32(gamma) * jnp.log(tail.astype(jnp.float32)))
    return jnp.concatenate([out_main, tail_out.astype(dtype)]).reshape(orig_shape)


if __name__ == "__main__":
    key = jax.random.PRNGKey(0)
    # Small NCHW input with positive values (fractional pow of negatives is
    # NaN in both PyTorch and JAX, so parity is preserved either way).
    x = jax.random.uniform(
        key, (2, 4, 16, 16), dtype=jnp.float32, minval=0.01, maxval=2.0
    )

    out = gamma_module(x)
    out = jax.block_until_ready(out)

    ref = jnp.power(x, GAMMA)
    assert out.shape == x.shape
    assert jnp.allclose(out, ref, atol=1e-5, rtol=1e-5)

    print("KERNEL_OK")
</pallas_src>

<mosaic_0001>
module attributes {stable_mosaic.version = 11 : i64} {
  func.func @_gamma_kernel(%arg0: i32, %arg1: memref<1x2048xf32, #tpu.memory_space<vmem>>, %arg2: memref<1x2048xf32, #tpu.memory_space<vmem>>) attributes {dimension_semantics = [#tpu.dimension_semantics<parallel>], iteration_bounds = array<i64: 1>, scalar_prefetch = 0 : i64, scratch_operands = 0 : i64, tpu.core_type = #tpu.core_type<tc>, window_params = [{transform_indices = @transform_0, window_bounds = array<i64: 1, 2048>}, {transform_indices = @transform_1, window_bounds = array<i64: 1, 2048>}]} {
    %c0 = arith.constant 0 : index
    %c0_0 = arith.constant 0 : index
    %0 = vector.load %arg1[%c0, %c0_0] : memref<1x2048xf32, #tpu.memory_space<vmem>>, vector<1x2048xf32>
    %1 = math.log %0 : vector<1x2048xf32>
    %cst = arith.constant 0.699999988 : f32
    %2 = vector.broadcast %cst : f32 to vector<1x2048xf32>
    %3 = arith.mulf %2, %1 : vector<1x2048xf32>
    %4 = math.exp %3 : vector<1x2048xf32>
    %c0_1 = arith.constant 0 : index
    %c0_2 = arith.constant 0 : index
    %5 = vector.load %arg2[%c0_1, %c0_2] : memref<1x2048xf32, #tpu.memory_space<vmem>>, vector<1x2048xf32>
    tpu.vector_store %arg2[%c0_1, %c0_2], %4 {strides = array<i32>} : memref<1x2048xf32, #tpu.memory_space<vmem>>, vector<1x2048xf32>,
    return
  }
  func.func @transform_0(%arg0: i32) -> (i32, i32) {
    %c0_i32 = arith.constant 0 : i32
    %c0_i32_0 = arith.constant 0 : i32
    return %arg0, %c0_i32 : i32, i32
  }
  func.func @transform_1(%arg0: i32) -> (i32, i32) {
    %c0_i32 = arith.constant 0 : i32
    %c0_i32_0 = arith.constant 0 : i32
    return %arg0, %c0_i32 : i32, i32
  }
}

</mosaic_0001>

<bundles_post_ra>
// kernel: tpu_custom_call.1
= control target key start
LH: loop header
LB: loop body
LE: loop exit
PB: predicated region body
PF: predicated region fallthrough
CT: control target
= control target key end

     0   :  { %6 = vsyncpa [#allocation3], 0  ;;  %s134_s0 = inlined_call_operand.hbm [shape: f32[1,2048], index: 0, kind: input, shape index: {}]   ;;  %s135_s1 = inlined_call_operand.hbm [shape: f32[1,2048], index: 1, kind: output, shape index: {}]  }
   0x1   :  { %7 = vsyncpa [#allocation4], 0  ;;  %s13_s8 = sshll.u32 %s134_s0, 4  ;;  %s116_s9 = smov [#allocation2]   ;;  %s14_s8 = int_to_ptr.hbm [resolvable:$true] %s13_s8 }
   0x2   :  { %s15_s10 = sshll.u32 %s116_s9, 4  ;;  %s16_s10 = int_to_ptr.vmem [resolvable:$true] %s15_s10 }
   0x3   :  { %18 = dma.hbm_to_vmem [thread:$0]  %s14_s8, 256, %s16_s10, [#allocation3]  }
   0x4   :  { %112 = dma.done.wait [#allocation3], 256  }
   0x5   :  { %113 = vsyncadd [#allocation3], 4294967040  ;;  %v23_v0 = vld [vmem:[#allocation2] sm:$0xff]  ;;  %v24_v1 = vld [vmem:[#allocation2 + $0x8] sm:$0xff]  ;;  %s117_s0 = smov [#allocation5]   ;;  %s44_s14 = sshll.u32 %s135_s1, 4  ;;  %s45_s14 = int_to_ptr.hbm [resolvable:$true] %s44_s14 }
   0x6   :  { %56 = vlog2.f32 %v23_v0  ;;  %s42_s11 = sshll.u32 %s117_s0, 4  ;;  %s43_s11 = int_to_ptr.vmem [resolvable:$true] %s42_s11 }
   0x7   :  { %58 = vlog2.f32 %v24_v1 }
   0xc   :  { %v57_v2 = vpop.eup %56 }
   0xd   :  { %v59_v3 = vpop.eup %58  ;;  %v26_v4 = vmul.f32 0.6931472, %v57_v2 }
   0xe   :  { %v28_v5 = vmul.f32 0.6931472, %v59_v3 }
   0xf   :  { %v29_v6 = vmul.f32 0.7, %v26_v4 }
  0x10   :  { %v30_v7 = vmul.f32 0.7, %v28_v5 }
  0x11   :  { %v31_v8 = vmul.f32 1.442695, %v29_v6 }
  0x12   :  { %v33_v9 = vmul.f32 1.442695, %v30_v7 }
  0x13   :  { %60 = vpow2.f32 %v31_v8 }
  0x14   :  { %62 = vpow2.f32 %v33_v9 }
  0x19   :  { %v61_v10 = vpop.eup %60 }
  0x1a   :  { %v63_v11 = vpop.eup %62  ;;  %35 = vst [vmem:[#allocation5] sm:$0xff] %v61_v10 }
  0x1b   :  { %36 = vst [vmem:[#allocation5 + $0x8] sm:$0xff] %v63_v11 }
  0x1c   :  { %47 = dma.vmem_to_hbm [thread:$0]  %s43_s11, 256, %s45_s14, [#allocation4]  }
  0x1d   :  { %114 = dma.done.wait [#allocation4], 256  }
  0x1e   :  { %115 = vsyncadd [#allocation4], 4294967040 }
  0x1f   :  { %52 = vsyncpa [#allocation3], 1 }
  0x20   :  { %53 = vsyncpa [#allocation4], 1 }

</bundles_post_ra>
